<compile_context>
chip_gen: v7x
topology: tpu7x:2x2x1
jax: 0.10.0
libtpu: 0.0.40
codegen_flags: <defaults>
</compile_context>

<pallas_src>
import functools

import jax
import jax.numpy as jnp
from jax.experimental import pallas as pl
from jax.experimental.pallas import tpu as pltpu

_EPS = 1e-12


def _l2_normalize(x, eps=_EPS):
    # matches torch.nn.functional.normalize(x, dim=1): x / max(||x||_2, eps)
    return x / jnp.maximum(jnp.sqrt(jnp.sum(x * x, axis=-1, keepdims=True)), eps)


def _ssl_score_kernel(cols_ref, tgt_ref, aux_ref, all_ref,
                      pos_ref, ttl_ref, tgtn_scr,
                      *, inv_temp, tile_n, n_valid, n_tiles, tiles_per_split,
                      has_mask, tail_possible):
    """Grid = (n_splits, tiles_per_split); axis 0 is the per-TensorCore split of
    the all-entities reduction, axis 1 iterates tiles within a split.

    cols_ref: [B, 1] int32   global column zeroed per batch row (-1 => none)
    tgt_ref : [B, D]         target-behavior embeddings of the batch
    aux_ref : [B, D]         aux-behavior embeddings of the batch
    all_ref : [D, tile_n]    lane-dense tile of aux-behavior embeddings (ALL rows)
    pos_ref : [B, 1]         sum(norm_tgt * norm_aux, dim=1)     (per split slot)
    ttl_ref : [B, 1]         sum_j exp(score_ij / temp)          (per split slot)
    tgtn_scr: [B, D] f32     cached  norm_tgt * (1/temp)
    """
    c = pl.program_id(0)                 # split (TensorCore) index
    k = pl.program_id(1)                 # tile index within this split
    gk = c * tiles_per_split + k         # global tile index along N

    @pl.when(k == 0)
    def _init():
        tgt_n = _l2_normalize(tgt_ref[...].astype(jnp.float32))
        aux_n = _l2_normalize(aux_ref[...].astype(jnp.float32))
        pos_ref[...] = jnp.sum(tgt_n * aux_n, axis=-1, keepdims=True)
        tgtn_scr[...] = tgt_n * inv_temp          # fold 1/temp into cached query
        ttl_ref[...] = jnp.zeros_like(ttl_ref)

    a = all_ref[...]                                    # (D, tile_n), lane-dense
    af = a.astype(jnp.float32)                          # f32 math for sum-of-squares
    ssq = jnp.sum(af * af, axis=0, keepdims=True)       # (1, tile_n)
    inv_norm = 1.0 / jnp.maximum(jnp.sqrt(ssq), _EPS)   # torch eps semantics

    # [B, tile_n] raw similarity on the MXU (natural [K, N] rhs layout, bf16-capable),
    # then scale each column by the entity's inverse norm.
    s = jax.lax.dot_general(
        tgtn_scr[...].astype(a.dtype), a,
        dimension_numbers=(((1,), (0,)), ((), ())),
        preferred_element_type=jnp.float32)
    s = s * inv_norm

    col = gk * tile_n + jax.lax.broadcasted_iota(jnp.int32, s.shape, 1)
    if has_mask:
        s = jnp.where(col == cols_ref[...], 0.0, s)     # zeroed score => exp(0)=1
    p = jnp.exp(s)

    if tail_possible:
        last = n_tiles - 1
        # padded-tail / duplicated-clamped tiles only exist at gk >= last

        @pl.when(gk < last)
        def _acc_body():
            ttl_ref[...] += jnp.sum(p, axis=-1, keepdims=True)

        @pl.when(gk >= last)
        def _acc_tail():
            ttl_ref[...] += jnp.sum(jnp.where(col < n_valid, p, 0.0),
                                    axis=-1, keepdims=True)
    else:
        ttl_ref[...] += jnp.sum(p, axis=-1, keepdims=True)


def _ssl_scores(tgt, aux, all_t, mask_cols, ssl_temp, *, tile_n=16384,
                num_splits=2, has_mask=True,
                stream_vmem_budget_bytes=8 * 1024 * 1024):
    """Returns (pos[B], ttl[B]) where pos = <n_tgt, n_aux> and
    ttl = sum_j exp(masked <n_tgt, n_all_j> / temp).  all_t is [D, N] (lane-dense)."""
    B, D = tgt.shape
    Dt, N = all_t.shape
    assert Dt == D

    itemsize = jnp.dtype(all_t.dtype).itemsize
    # Keep the double-buffered stream inside a few MiB (fits every generation's
    # default scoped VMEM, incl. v5e 16 MiB and v7x's 64 MiB physical).
    max_tile = max(128, stream_vmem_budget_bytes // (2 * D * itemsize))
    tile_n = int(min(int(tile_n), max_tile))
    if tile_n >= N:
        tile_n = N                                     # single full-extent tile
    else:
        tile_n = max(128, (tile_n // 128) * 128)       # lane-aligned when tiling

    n_tiles = -(-N // tile_n)
    n_splits = max(1, min(int(num_splits), n_tiles))   # size-2 "parallel" split (v7x)
    tiles_per_split = -(-n_tiles // n_splits)
    tail_possible = (N % tile_n != 0) or (n_splits * tiles_per_split != n_tiles)

    kernel = functools.partial(
        _ssl_score_kernel, inv_temp=1.0 / ssl_temp, tile_n=tile_n, n_valid=N,
        n_tiles=n_tiles, tiles_per_split=tiles_per_split,
        has_mask=has_mask, tail_possible=tail_possible)

    def all_map(c, k):
        # clamp duplicated trailing tiles; their columns are >= n_valid and masked
        return (0, jnp.minimum(c * tiles_per_split + k, n_tiles - 1))

    pos, ttl = pl.pallas_call(
        kernel,
        out_shape=(jax.ShapeDtypeStruct((n_splits, B, 1), jnp.float32),
                   jax.ShapeDtypeStruct((n_splits, B, 1), jnp.float32)),
        grid_spec=pltpu.PrefetchScalarGridSpec(
            num_scalar_prefetch=0,
            grid=(n_splits, tiles_per_split),
            in_specs=[
                pl.BlockSpec((B, 1), lambda c, k: (0, 0)),    # masked col per row
                pl.BlockSpec((B, D), lambda c, k: (0, 0)),    # tgt batch
                pl.BlockSpec((B, D), lambda c, k: (0, 0)),    # aux batch
                pl.BlockSpec((D, tile_n), all_map),           # all-entities tile
            ],
            out_specs=[
                pl.BlockSpec((None, B, 1), lambda c, k: (c, 0, 0)),
                pl.BlockSpec((None, B, 1), lambda c, k: (c, 0, 0)),
            ],
            scratch_shapes=[pltpu.VMEM((B, D), jnp.float32)],
        ),
        compiler_params=pltpu.CompilerParams(
            dimension_semantics=("parallel", "arbitrary")),
    )(mask_cols, tgt, aux, all_t)

    return pos[0, :, 0], jnp.sum(ttl[:, :, 0], axis=0)


def ssl_loss2_forward(input_u_list, input_i_list, ua_embeddings, ia_embeddings,
                      aux_beh, *, ssl_temp, ssl_reg_inter, ssl_mode_inter,
                      user_batch_indices=None, item_batch_indices=None,
                      tile_n=16384, num_splits=2, stream_dtype=None):
    """JAX/Pallas port of SSLoss2.forward.

    `user_batch_indices` is interpreted as the advanced-index pair (rows, cols) of
    ttl_score entries set to 0.0 before the exp (mirrors
    `ttl_score[user_batch_indices] = 0.0`).  `item_batch_indices` is accepted but
    unused, exactly as in the PyTorch module.  `stream_dtype=jnp.bfloat16` halves
    the dominant HBM stream (the cast fuses into the same copy as the behavior
    slice + transpose, so it is not an extra HBM pass).
    """
    del item_batch_indices   # unused in the reference forward as well
    loss = jnp.float32(0.0)

    def one_side(table, idx_list, batch_indices):
        tgt = table[idx_list, -1, :]
        aux = table[idx_list, aux_beh, :]
        # Lane-dense [D, N] stream for the kernel: slice + transpose (+ cast)
        # fuse into one XLA copy feeding the pallas_call.
        all_t = jnp.transpose(table[:, aux_beh, :])
        if stream_dtype is not None:
            all_t = all_t.astype(stream_dtype)
        B = tgt.shape[0]
        cols = jnp.full((B,), -1, jnp.int32)
        if batch_indices is not None:
            rows, cidx = batch_indices
            # TODO(synk): supports at most one zeroed column per batch row (rows must
            # be unique); the torch advanced index allows arbitrary (row, col) pairs.
            cols = cols.at[rows].set(cidx.astype(jnp.int32))
        pos, ttl = _ssl_scores(tgt, aux, all_t, cols.reshape(B, 1), ssl_temp,
                               tile_n=tile_n, num_splits=num_splits,
                               has_mask=batch_indices is not None)
        pos_e = jnp.exp(pos / ssl_temp)
        return -jnp.sum(jnp.log(pos_e / ttl))

    if ssl_mode_inter in ("user_side", "both_side"):
        loss = loss + one_side(ua_embeddings, input_u_list,
                               user_batch_indices) * ssl_reg_inter[aux_beh]
    if ssl_mode_inter in ("item_side", "both_side"):
        loss = loss + one_side(ia_embeddings, input_i_list,
                               None) * ssl_reg_inter[aux_beh]
    return loss


def _reference_loss(input_u_list, input_i_list, ua, ia, aux_beh, *,
                    ssl_temp, ssl_reg_inter, ssl_mode_inter,
                    user_batch_indices=None):
    """Pure-JAX reference replicating the PyTorch math for verification."""
    loss = jnp.float32(0.0)
    if ssl_mode_inter in ("user_side", "both_side"):
        n_tgt = _l2_normalize(ua[input_u_list, -1, :])
        n_aux = _l2_normalize(ua[input_u_list, aux_beh, :])
        n_all = _l2_normalize(ua[:, aux_beh, :])
        pos = jnp.sum(n_tgt * n_aux, axis=1)
        ttl = n_tgt @ n_all.T
        if user_batch_indices is not None:
            rows, cols = user_batch_indices
            ttl = ttl.at[rows, cols].set(0.0)
        pos = jnp.exp(pos / ssl_temp)
        ttl = jnp.sum(jnp.exp(ttl / ssl_temp), axis=1)
        loss = loss + (-jnp.sum(jnp.log(pos / ttl))) * ssl_reg_inter[aux_beh]
    if ssl_mode_inter in ("item_side", "both_side"):
        n_tgt = _l2_normalize(ia[input_i_list, -1, :])
        n_aux = _l2_normalize(ia[input_i_list, aux_beh, :])
        n_all = _l2_normalize(ia[:, aux_beh, :])
        pos = jnp.sum(n_tgt * n_aux, axis=1)
        ttl = n_tgt @ n_all.T
        pos = jnp.exp(pos / ssl_temp)
        ttl = jnp.sum(jnp.exp(ttl / ssl_temp), axis=1)
        loss = loss + (-jnp.sum(jnp.log(pos / ttl))) * ssl_reg_inter[aux_beh]
    return loss


if __name__ == "__main__":
    key = jax.random.PRNGKey(0)
    k1, k2, k3, k4 = jax.random.split(key, 4)

    n_users, n_items = 384, 330        # 330 exercises the padded last tile
    n_behaviors, emb_dim, batch = 3, 32, 8
    aux_beh = 1
    ssl_temp = 0.2
    ssl_reg_inter = (0.1, 0.2, 0.3)    # stand-in for eval(args.ssl_reg_inter)
    ssl_mode_inter = "both_side"

    # deterministic synthetic "embedding tables" (module has no learned params of its own)
    ua_embeddings = jax.random.normal(k1, (n_users, n_behaviors, emb_dim), jnp.float32)
    ia_embeddings = jax.random.normal(k2, (n_items, n_behaviors, emb_dim), jnp.float32)
    input_u_list = jax.random.randint(k3, (batch,), 0, n_users)
    input_i_list = jax.random.randint(k4, (batch,), 0, n_items)

    # ttl_score[arange(B), input_u_list] = 0.0 (self-similarity removal, user side)
    user_batch_indices = (jnp.arange(batch), input_u_list)

    ref = _reference_loss(
        input_u_list, input_i_list, ua_embeddings, ia_embeddings, aux_beh,
        ssl_temp=ssl_temp, ssl_reg_inter=ssl_reg_inter,
        ssl_mode_inter=ssl_mode_inter, user_batch_indices=user_batch_indices)
    ref = jax.block_until_ready(ref)

    # f32, small tile: exercises multi-tile + 2-way split + padded-tail code paths
    loss_small = ssl_loss2_forward(
        input_u_list, input_i_list, ua_embeddings, ia_embeddings, aux_beh,
        ssl_temp=ssl_temp, ssl_reg_inter=ssl_reg_inter,
        ssl_mode_inter=ssl_mode_inter,
        user_batch_indices=user_batch_indices, item_batch_indices=None,
        tile_n=128)
    loss_small = jax.block_until_ready(loss_small)
    assert jnp.allclose(loss_small, ref, rtol=1e-4, atol=1e-4), (loss_small, ref)

    # f32, default (large) tile: single full-extent tile per side
    loss_big = ssl_loss2_forward(
        input_u_list, input_i_list, ua_embeddings, ia_embeddings, aux_beh,
        ssl_temp=ssl_temp, ssl_reg_inter=ssl_reg_inter,
        ssl_mode_inter=ssl_mode_inter,
        user_batch_indices=user_batch_indices, item_batch_indices=None)
    loss_big = jax.block_until_ready(loss_big)
    assert jnp.allclose(loss_big, ref, rtol=1e-4, atol=1e-4), (loss_big, ref)

    # bf16-streamed variant (halves the dominant HBM stream, native bf16 MXU)
    loss_bf16 = ssl_loss2_forward(
        input_u_list, input_i_list, ua_embeddings, ia_embeddings, aux_beh,
        ssl_temp=ssl_temp, ssl_reg_inter=ssl_reg_inter,
        ssl_mode_inter=ssl_mode_inter,
        user_batch_indices=user_batch_indices, item_batch_indices=None,
        tile_n=128, stream_dtype=jnp.bfloat16)
    loss_bf16 = jax.block_until_ready(loss_bf16)
    assert jnp.allclose(loss_bf16, ref, rtol=5e-2, atol=5e-2), (loss_bf16, ref)

    print("KERNEL_OK")
</pallas_src>

<mosaic_0001>
module attributes {stable_mosaic.version = 11 : i64} {
  func.func @_ssl_score_kernel(%arg0: i32, %arg1: i32, %arg2: memref<8x1xi32, #tpu.memory_space<vmem>>, %arg3: memref<8x32xf32, #tpu.memory_space<vmem>>, %arg4: memref<8x32xf32, #tpu.memory_space<vmem>>, %arg5: memref<32x128xf32, #tpu.memory_space<vmem>>, %arg6: memref<1x8x1xf32, #tpu.memory_space<vmem>>, %arg7: memref<1x8x1xf32, #tpu.memory_space<vmem>>, %arg8: memref<8x32xf32, #tpu.memory_space<vmem>>) attributes {dimension_semantics = [#tpu.dimension_semantics<parallel>, #tpu.dimension_semantics<arbitrary>], iteration_bounds = array<i64: 2, 2>, scalar_prefetch = 0 : i64, scratch_operands = 1 : i64, tpu.core_type = #tpu.core_type<tc>, window_params = [{pipeline_mode = #tpu.pipeline_mode<synchronous>, transform_indices = @transform_0, window_bounds = array<i64: 8, 1>}, {pipeline_mode = #tpu.pipeline_mode<synchronous>, transform_indices = @transform_1, window_bounds = array<i64: 8, 32>}, {pipeline_mode = #tpu.pipeline_mode<synchronous>, transform_indices = @transform_2, window_bounds = array<i64: 8, 32>}, {transform_indices = @transform_3, window_bounds = array<i64: 32, 128>}, {transform_indices = @transform_4, window_bounds = array<i64: 1, 8, 1>}, {transform_indices = @transform_5, window_bounds = array<i64: 1, 8, 1>}]} {
    %c2_i32 = arith.constant 2 : i32
    %0 = arith.muli %arg0, %c2_i32 : i32
    %1 = arith.addi %0, %arg1 : i32
    %c0_i32 = arith.constant 0 : i32
    %2 = arith.cmpi eq, %arg1, %c0_i32 : i32
    %3 = arith.extui %2 : i1 to i32
    %c0_i32_0 = arith.constant 0 : i32
    %4 = arith.cmpi ne, %3, %c0_i32_0 : i32
    scf.if %4 {
      %c0_14 = arith.constant 0 : index
      %c0_15 = arith.constant 0 : index
      %34 = vector.load %arg3[%c0_14, %c0_15] : memref<8x32xf32, #tpu.memory_space<vmem>>, vector<8x32xf32>
      %35 = arith.mulf %34, %34 : vector<8x32xf32>
      %cst_16 = arith.constant dense<0.000000e+00> : vector<8xf32>
      %36 = vector.multi_reduction <add>, %35, %cst_16 [1] : vector<8x32xf32> to vector<8xf32>
      %37 = vector.shape_cast %36 : vector<8xf32> to vector<8x1xf32>
      %38 = math.sqrt %37 : vector<8x1xf32>
      %cst_17 = arith.constant 9.99999996E-13 : f32
      %39 = vector.broadcast %cst_17 : f32 to vector<8x1xf32>
      %40 = arith.maximumf %38, %39 : vector<8x1xf32>
      %41 = vector.broadcast %40 : vector<8x1xf32> to vector<8x32xf32>
      %42 = arith.divf %34, %41 : vector<8x32xf32>
      %c0_18 = arith.constant 0 : index
      %c0_19 = arith.constant 0 : index
      %43 = vector.load %arg4[%c0_18, %c0_19] : memref<8x32xf32, #tpu.memory_space<vmem>>, vector<8x32xf32>
      %44 = arith.mulf %43, %43 : vector<8x32xf32>
      %cst_20 = arith.constant dense<0.000000e+00> : vector<8xf32>
      %45 = vector.multi_reduction <add>, %44, %cst_20 [1] : vector<8x32xf32> to vector<8xf32>
      %46 = vector.shape_cast %45 : vector<8xf32> to vector<8x1xf32>
      %47 = math.sqrt %46 : vector<8x1xf32>
      %cst_21 = arith.constant 9.99999996E-13 : f32
      %48 = vector.broadcast %cst_21 : f32 to vector<8x1xf32>
      %49 = arith.maximumf %47, %48 : vector<8x1xf32>
      %50 = vector.broadcast %49 : vector<8x1xf32> to vector<8x32xf32>
      %51 = arith.divf %43, %50 : vector<8x32xf32>
      %52 = arith.mulf %42, %51 : vector<8x32xf32>
      %cst_22 = arith.constant dense<0.000000e+00> : vector<8xf32>
      %53 = vector.multi_reduction <add>, %52, %cst_22 [1] : vector<8x32xf32> to vector<8xf32>
      %54 = vector.shape_cast %53 : vector<8xf32> to vector<8x1xf32>
      %c0_23 = arith.constant 0 : index
      %c0_24 = arith.constant 0 : index
      %c0_25 = arith.constant 0 : index
      %55 = vector.load %arg6[%c0_23, %c0_24, %c0_25] : memref<1x8x1xf32, #tpu.memory_space<vmem>>, vector<1x8x1xf32>
      %56 = vector.shape_cast %55 : vector<1x8x1xf32> to vector<8x1xf32>
      %57 = vector.shape_cast %54 : vector<8x1xf32> to vector<1x8x1xf32>
      tpu.vector_store %arg6[%c0_23, %c0_24, %c0_25], %57 {strides = array<i32>} : memref<1x8x1xf32, #tpu.memory_space<vmem>>, vector<1x8x1xf32>,
      %cst_26 = arith.constant 5.000000e+00 : f32
      %58 = vector.broadcast %cst_26 : f32 to vector<8x32xf32>
      %59 = arith.mulf %42, %58 : vector<8x32xf32>
      %c0_27 = arith.constant 0 : index
      %c0_28 = arith.constant 0 : index
      %60 = vector.load %arg8[%c0_27, %c0_28] : memref<8x32xf32, #tpu.memory_space<vmem>>, vector<8x32xf32>
      tpu.vector_store %arg8[%c0_27, %c0_28], %59 {strides = array<i32>} : memref<8x32xf32, #tpu.memory_space<vmem>>, vector<8x32xf32>,
      %cst_29 = arith.constant 0.000000e+00 : f32
      %61 = vector.broadcast %cst_29 : f32 to vector<8x1xf32>
      %c0_30 = arith.constant 0 : index
      %c0_31 = arith.constant 0 : index
      %c0_32 = arith.constant 0 : index
      %62 = vector.load %arg7[%c0_30, %c0_31, %c0_32] : memref<1x8x1xf32, #tpu.memory_space<vmem>>, vector<1x8x1xf32>
      %63 = vector.shape_cast %62 : vector<1x8x1xf32> to vector<8x1xf32>
      %64 = vector.shape_cast %61 : vector<8x1xf32> to vector<1x8x1xf32>
      tpu.vector_store %arg7[%c0_30, %c0_31, %c0_32], %64 {strides = array<i32>} : memref<1x8x1xf32, #tpu.memory_space<vmem>>, vector<1x8x1xf32>,
    } else {
    }
    %c0 = arith.constant 0 : index
    %c0_1 = arith.constant 0 : index
    %5 = vector.load %arg5[%c0, %c0_1] : memref<32x128xf32, #tpu.memory_space<vmem>>, vector<32x128xf32>
    %6 = arith.mulf %5, %5 : vector<32x128xf32>
    %cst = arith.constant dense<0.000000e+00> : vector<128xf32>
    %7 = vector.multi_reduction <add>, %6, %cst [0] : vector<32x128xf32> to vector<128xf32>
    %8 = vector.shape_cast %7 : vector<128xf32> to vector<1x128xf32>
    %9 = math.sqrt %8 : vector<1x128xf32>
    %cst_2 = arith.constant 9.99999996E-13 : f32
    %10 = vector.broadcast %cst_2 : f32 to vector<1x128xf32>
    %11 = arith.maximumf %9, %10 : vector<1x128xf32>
    %cst_3 = arith.constant 1.000000e+00 : f32
    %12 = vector.broadcast %cst_3 : f32 to vector<1x128xf32>
    %13 = arith.divf %12, %11 : vector<1x128xf32>
    %c0_4 = arith.constant 0 : index
    %c0_5 = arith.constant 0 : index
    %14 = vector.load %arg8[%c0_4, %c0_5] : memref<8x32xf32, #tpu.memory_space<vmem>>, vector<8x32xf32>
    %cst_6 = arith.constant dense<0.000000e+00> : vector<8x128xf32>
    %15 = tpu.matmul %14, %5, %cst_6 {dimension_numbers = #tpu.dot_dimension_numbers<[1], [0], [0], [1], [0, 0, 1, 1], [], []>} : vector<8x32xf32>, vector<32x128xf32>, vector<8x128xf32> -> vector<8x128xf32>
    %16 = vector.broadcast %13 : vector<1x128xf32> to vector<8x128xf32>
    %17 = arith.mulf %15, %16 : vector<8x128xf32>
    %c128_i32 = arith.constant 128 : i32
    %18 = arith.muli %1, %c128_i32 : i32
    %19 = tpu.iota {dimensions = array<i32: 1>} : vector<8x128xi32>
    %20 = vector.broadcast %18 : i32 to vector<8x128xi32>
    %21 = arith.addi %20, %19 : vector<8x128xi32>
    %c0_7 = arith.constant 0 : index
    %c0_8 = arith.constant 0 : index
    %22 = vector.load %arg2[%c0_7, %c0_8] : memref<8x1xi32, #tpu.memory_space<vmem>>, vector<8x1xi32>
    %23 = vector.broadcast %22 : vector<8x1xi32> to vector<8x128xi32>
    %24 = arith.cmpi eq, %21, %23 : vector<8x128xi32>
    %cst_9 = arith.constant 0.000000e+00 : f32
    %25 = vector.broadcast %cst_9 : f32 to vector<8x128xf32>
    %26 = arith.select %24, %25, %17 : vector<8x128xi1>, vector<8x128xf32>
    %27 = math.exp %26 : vector<8x128xf32>
    %c2_i32_10 = arith.constant 2 : i32
    %28 = arith.cmpi slt, %1, %c2_i32_10 : i32
    %29 = arith.extui %28 : i1 to i32
    %c0_i32_11 = arith.constant 0 : i32
    %30 = arith.cmpi ne, %29, %c0_i32_11 : i32
    scf.if %30 {
      %c0_14 = arith.constant 0 : index
      %c0_15 = arith.constant 0 : index
      %c0_16 = arith.constant 0 : index
      %34 = vector.load %arg7[%c0_14, %c0_15, %c0_16] : memref<1x8x1xf32, #tpu.memory_space<vmem>>, vector<1x8x1xf32>
      %35 = vector.shape_cast %34 : vector<1x8x1xf32> to vector<8x1xf32>
      %cst_17 = arith.constant dense<0.000000e+00> : vector<8xf32>
      %36 = vector.multi_reduction <add>, %27, %cst_17 [1] : vector<8x128xf32> to vector<8xf32>
      %37 = vector.shape_cast %36 : vector<8xf32> to vector<8x1xf32>
      %38 = arith.addf %35, %37 : vector<8x1xf32>
      %c0_18 = arith.constant 0 : index
      %c0_19 = arith.constant 0 : index
      %c0_20 = arith.constant 0 : index
      %39 = vector.load %arg7[%c0_18, %c0_19, %c0_20] : memref<1x8x1xf32, #tpu.memory_space<vmem>>, vector<1x8x1xf32>
      %40 = vector.shape_cast %39 : vector<1x8x1xf32> to vector<8x1xf32>
      %41 = vector.shape_cast %38 : vector<8x1xf32> to vector<1x8x1xf32>
      tpu.vector_store %arg7[%c0_18, %c0_19, %c0_20], %41 {strides = array<i32>} : memref<1x8x1xf32, #tpu.memory_space<vmem>>, vector<1x8x1xf32>,
    } else {
    }
    %c2_i32_12 = arith.constant 2 : i32
    %31 = arith.cmpi sge, %1, %c2_i32_12 : i32
    %32 = arith.extui %31 : i1 to i32
    %c0_i32_13 = arith.constant 0 : i32
    %33 = arith.cmpi ne, %32, %c0_i32_13 : i32
    scf.if %33 {
      %c0_14 = arith.constant 0 : index
      %c0_15 = arith.constant 0 : index
      %c0_16 = arith.constant 0 : index
      %34 = vector.load %arg7[%c0_14, %c0_15, %c0_16] : memref<1x8x1xf32, #tpu.memory_space<vmem>>, vector<1x8x1xf32>
      %35 = vector.shape_cast %34 : vector<1x8x1xf32> to vector<8x1xf32>
      %c384_i32 = arith.constant 384 : i32
      %36 = vector.broadcast %c384_i32 : i32 to vector<8x128xi32>
      %37 = arith.cmpi slt, %21, %36 : vector<8x128xi32>
      %cst_17 = arith.constant 0.000000e+00 : f32
      %38 = vector.broadcast %cst_17 : f32 to vector<8x128xf32>
      %39 = arith.select %37, %27, %38 : vector<8x128xi1>, vector<8x128xf32>
      %cst_18 = arith.constant dense<0.000000e+00> : vector<8xf32>
      %40 = vector.multi_reduction <add>, %39, %cst_18 [1] : vector<8x128xf32> to vector<8xf32>
      %41 = vector.shape_cast %40 : vector<8xf32> to vector<8x1xf32>
      %42 = arith.addf %35, %41 : vector<8x1xf32>
      %c0_19 = arith.constant 0 : index
      %c0_20 = arith.constant 0 : index
      %c0_21 = arith.constant 0 : index
      %43 = vector.load %arg7[%c0_19, %c0_20, %c0_21] : memref<1x8x1xf32, #tpu.memory_space<vmem>>, vector<1x8x1xf32>
      %44 = vector.shape_cast %43 : vector<1x8x1xf32> to vector<8x1xf32>
      %45 = vector.shape_cast %42 : vector<8x1xf32> to vector<1x8x1xf32>
      tpu.vector_store %arg7[%c0_19, %c0_20, %c0_21], %45 {strides = array<i32>} : memref<1x8x1xf32, #tpu.memory_space<vmem>>, vector<1x8x1xf32>,
    } else {
    }
    return
  }
  func.func @transform_0(%arg0: i32, %arg1: i32) -> (i32, i32) {
    %c0_i32 = arith.constant 0 : i32
    %c0_i32_0 = arith.constant 0 : i32
    %c0_i32_1 = arith.constant 0 : i32
    return %c0_i32, %c0_i32_0 : i32, i32
  }
  func.func @transform_1(%arg0: i32, %arg1: i32) -> (i32, i32) {
    %c0_i32 = arith.constant 0 : i32
    %c0_i32_0 = arith.constant 0 : i32
    %c0_i32_1 = arith.constant 0 : i32
    return %c0_i32, %c0_i32_0 : i32, i32
  }
  func.func @transform_2(%arg0: i32, %arg1: i32) -> (i32, i32) {
    %c0_i32 = arith.constant 0 : i32
    %c0_i32_0 = arith.constant 0 : i32
    %c0_i32_1 = arith.constant 0 : i32
    return %c0_i32, %c0_i32_0 : i32, i32
  }
  func.func @transform_3(%arg0: i32, %arg1: i32) -> (i32, i32) {
    %c2_i32 = arith.constant 2 : i32
    %0 = arith.muli %arg0, %c2_i32 : i32
    %1 = arith.addi %0, %arg1 : i32
    %c2_i32_0 = arith.constant 2 : i32
    %2 = arith.minsi %1, %c2_i32_0 : i32
    %c0_i32 = arith.constant 0 : i32
    %c0_i32_1 = arith.constant 0 : i32
    return %c0_i32, %2 : i32, i32
  }
  func.func @transform_4(%arg0: i32, %arg1: i32) -> (i32, i32, i32) {
    %c0_i32 = arith.constant 0 : i32
    %c0_i32_0 = arith.constant 0 : i32
    %c0_i32_1 = arith.constant 0 : i32
    return %arg0, %c0_i32, %c0_i32_0 : i32, i32, i32
  }
  func.func @transform_5(%arg0: i32, %arg1: i32) -> (i32, i32, i32) {
    %c0_i32 = arith.constant 0 : i32
    %c0_i32_0 = arith.constant 0 : i32
    %c0_i32_1 = arith.constant 0 : i32
    return %arg0, %c0_i32, %c0_i32_0 : i32, i32, i32
  }
}

</mosaic_0001>

<bundles_post_ra>
// kernel: tpu_custom_call.1
= control target key start
LH: loop header
LB: loop body
LE: loop exit
PB: predicated region body
PF: predicated region fallthrough
CT: control target
= control target key end

     0   :  { %11 = vsyncpa [#allocation4], 0  ;;  %s1035_s0 = inlined_call_operand.vmem [shape: s32[8,1], index: 0, kind: input, shape index: {}]   ;;  %s1036_s1 = inlined_call_operand.vmem [shape: f32[8,32], index: 1, kind: input, shape index: {}]   ;;  %s1037_s2 = inlined_call_operand.vmem [shape: f32[8,32], index: 2, kind: input, shape index: {}]   ;;  %s1038_s3 = inlined_call_operand.hbm [shape: f32[32,384], index: 3, kind: input, shape index: {}]   ;;  %s1039_s4 = inlined_call_operand.vmem [shape: f32[2,8,1], index: 4, kind: output, shape index: {0}]   ;;  %s1040_s5 = inlined_call_operand.vmem [shape: f32[2,8,1], index: 5, kind: output, shape index: {1}]  }
   0x1   :  { %13 = vsyncpa [#allocation4 + $0x1], 0  ;;  %s846_s18 = smov 0   ;;  %s848_s19 = smov 0  }
   0x2   :  { %s850_s20 = smov 0   ;;  %s852_s21 = smov 0  }
   0x3   :  { %s854_s22 = smov 0   ;;  %s856_s23 = smov 0  }
   0x4   :  { %s858_s24 = smov 0   ;;  %s860_s25 = smov 0  }
   0x5 LB: > { %s572_s26 = sadd.s32 4294967295, %s805_s25   ;;  %s28_s27 = sadd.s32 1, %s797_s23  ;;  %s805_s25 = sphi %s860_s25, %s19_s25   ;;  %s801_s24 = sphi %s858_s24, %s1052_s24   ;;  %s797_s23 = sphi %s856_s23, %s1051_s23   ;;  %s793_s22 = sphi %s854_s22, %s1050_s22   ;;  %s789_s21 = sphi %s852_s21, %s1049_s21   ;;  %s785_s20 = sphi %s850_s20, %s1048_s20   ;;  %s781_s19 = sphi %s848_s19, %s1047_s19   ;;  %s777_s18 = sphi %s846_s18, %s1046_s18  }
   0x6   : > { %p29_p0 = scmp.ge.s32.totalorder %s28_s27, 2  ;;  %s31_s28 = sadd.s32 1, %s801_s24 }
   0x7   : > { %s574_s29 = sshll.u32 %s801_s24, 1  ;;  %s109_s30 = sadd.s32 1, %s785_s20 }
   0x8   : > { %s1054_s27 = smov (%p29_p0, %s28_s27), 0  ;;  %s1056_s28 = smov (!%p29_p0, %s31_s28), %s801_s24 }
   0x9   : > { %s99_s6 = sadd.s32 %s797_s23, %s574_s29  ;;  %p116_p1 = scmp.ne.s32.totalorder %s785_s20, %s781_s19 }
   0xa   : > { %p33_p2 = scmp.ge.s32.totalorder %s1056_s28, 2  ;;  %p100_p3 = scmp.lt.s32.totalorder %s99_s6, 2 }
   0xb   : > { %p117_p4 = scmp.eq.s32.totalorder %s805_s25, 0  ;;  %p122_p5 = scmp.ne.s32.totalorder %s781_s19, %s777_s18 }
   0xc   : > { %s1058_s28 = smov (%p33_p2, %s1056_s28), 0  ;;  %s1060_s6 = smov (!%p100_p3, %s99_s6), 2 }
   0xd   : > { %s575_s7 = sshll.u32 %s1058_s28, 1  ;;  %p900_p6 = por %p117_p4, %p116_p1 }
   0xe   : > { %s103_s9 = sadd.s32 %s575_s7, %s1054_s27  ;;  %p123_p7 = scmp.eq.s32.totalorder %s572_s26, 0 }
   0xf   : > { %p104_p8 = scmp.lt.s32.totalorder %s103_s9, 2  ;;  %p621_p10 = scmp.lt.s32.totalorder %s805_s25, 4 }
  0x10   : > { %p905_p9 = por %p123_p7, %p122_p5  ;;  %s207_s11 = sand.u32 1, %s785_s20  }
  0x11   : > { %s1062_s9 = smov (!%p104_p8, %s103_s9), 2  ;;  %s580_s12 = sshll.u32 %s1060_s6, 7 }
  0x12   : > { %s106_s13 = ssub.s32 %s1060_s6, %s1062_s9  ;;  %s578_s14 = sshll.u32 %s207_s11, 5 }
  0x13   : > { %p107_p11 = scmp.eq.s32.totalorder %s106_s13, 0  ;;  %s914_s17 = scalar_lea.hbm %s1038_s3, %s580_s12 }
  0x14   : > { %s211_s26 = scalar_lea.vmem [#allocation3], %s578_s14  ;;  %p921_p12 = pnand %p621_p10, %p900_p6 }
  0x15   : > { %s917_s18 = scalar_select %p107_p11, %s785_s20, %s109_s30  }
  0x16   : > { %s221_s29 = sshll.u32 %s211_s26, 4  ;;  %s928_s6 = scalar_lea.sflag [#allocation4], %s207_s11  ;;  %s925_s29 = int_to_ptr.vmem [resolvable:$true] %s221_s29 }
  0x17   : > { %s709_s9 = scalar_lea.hbm %s914_s17, 512  ;;  %p711_p1 = pneg %p921_p12 }
  0x18   : > { %p710_p0 = scmp.ne.s32.totalorder %s914_s17, %s709_s9  ;;  %s714_s12 = scalar_lea.hbm %s1038_s3, 1536 }
  0x19   : > { %p715_p4 = scmp.lt.u32.totalorder %s914_s17, %s1038_s3  ;;  %p716_p5 = scmp.lt.u32.totalorder %s714_s12, %s709_s9 }
  0x1a   : > { %p712_p2 = pnand %p711_p1, %p710_p0  ;;  %p718_p7 = scmp.lt.u32.totalorder %s709_s9, %s914_s17 }
  0x1b   : > { %p717_p6 = por %p716_p5, %p715_p4 }
  0x1c   : > { %p713_p3 = pneg %p712_p2 }
  0x1d   : > { %p719_p8 = por %p718_p7, %p717_p6 }
  0x1f   : > { %p720_p10 = pnand %p719_p8, %p713_p3 }
  0x21   : > { %723 = shalt.err (!%p720_p10)
}
  0x22   : > { %s724_s11 = scalar_lea.vmem %s925_s29, 512  ;;  %s807_s15 = smov [#allocation3]  }
  0x23   : > { %p725_p11 = scmp.ne.s32.totalorder %s925_s29, %s724_s11  ;;  %s729_s16 = sshll.u32 %s807_s15, 4  ;;  %s730_s16 = int_to_ptr.vmem [resolvable:$false] %s729_s16 }
  0x24   : > { %s731_s26 = scalar_lea.vmem %s730_s16, 1024  ;;  %p732_p13 = scmp.lt.s32.totalorder %s925_s29, %s730_s16 }
  0x25   : > { %p727_p0 = pnand %p725_p11, %p711_p1  ;;  %p733_p4 = scmp.lt.s32.totalorder %s731_s26, %s724_s11 }
  0x27   : > { %p728_p2 = pneg %p727_p0  ;;  %p734_p5 = por %p733_p4, %p732_p13 }
  0x29   : > { %p735_p6 = pnand %p734_p5, %p728_p2 }
  0x2b   : > { %738 = shalt.err (!%p735_p6)
}
  0x2c   : > { %s808_s9 = smov 384   ;;  %s809_s30 = smov 128  }
  0x2d   : > { %s810_s8 = smov 8   ;;  %p229_p1 = scmp.lt.s32.totalorder %s805_s25, 5 }
  0x2e   : > { %620 = dma.hbm_to_vmem [thread:$0]  (!%p921_p12), %s914_s17, 512, %s925_s29, %s928_s6, %s808_s9, %s809_s30, %s810_s8  }
  0x2f   : > { %p1044_p3 = scmp.ge.s32.totalorder %s805_s25, 1 }
  0x31   : > { %p230_p7 = pnand %p1044_p3, %p229_p1 }
  0x32   : > { %s235_s12 = sand.u32 (!%p230_p7), 1, %s781_s19  }
  0x33   : > { %233 = sbr.rel (%p230_p7) target bundleno = 918 (0x396), region = 36  ;;  %s582_s13 = sshll.u32 (!%p230_p7), %s235_s12, 5 }
  0x34   : > { %s236_s14 = scalar_lea.sflag (!%p230_p7), [#allocation4], %s235_s12  ;;  %s960_s11 = scalar_lea.vmem (!%p230_p7), [#allocation3], %s582_s13 }
  0x3a   : > { %772 = dma.done.wait (%p905_p9), %s236_s14, 512  }
  0x3b   : > { %774 = vsyncadd (%p905_p9), %s236_s14, 4294966784  ;;  %p273_p12 = scmp.lt.s32.totalorder %s793_s22, 1  ;;  %s585_s17 = sshll.u32 %s793_s22, 1 }
  0x3c   : > { %s969_s29 = sadd.s32 %s789_s21, %s585_s17  ;;  %p586_p9 = scmp.ne.s32.totalorder %s789_s21, 0 }
  0x3d   : > { %s1064_s22 = smov (!%p273_p12, %s793_s22), 1  ;;  %v287_v0 = vld [vmem:[%s1036_s1] sm:$0xff] (!%p586_p9)  ;;  %vm289_vm0 = vcmask (!%p586_p9), 261120   ;;  %vm322_vm1 = vcmask (!%p586_p9), 7168   ;;  %v811_v6 = vmov (!%p586_p9), 0.0  }
  0x3e   : > { %s583_s7 = sshll.u32 %s1064_s22, 3  ;;  %286 = sbr.rel (%p586_p9) target bundleno = 387 (0x183), region = 44  ;;  %v303_v1 = vld [vmem:[%s1037_s2] sm:$0xff] (!%p586_p9)  ;;  %v288_v2 = vmul.f32 (!%p586_p9), %v287_v0, %v287_v0 }
  0x3f   : > { %s975_s16 = scalar_lea.vmem %s1039_s4, %s583_s7  ;;  %s980_s10 = scalar_lea.vmem %s1040_s5, %s583_s7  ;;  %v304_v3 = vmul.f32 (!%p586_p9), %v303_v1, %v303_v1 }
  0x40   : > { %v290_v4 = vsel (!%p586_p9), %vm289_vm0, %v288_v2, 0.0  ;;  %326 = vst.msk [vmem:[%s980_s10] sm:$0xff] (!%p586_p9), %vm322_vm1, %v811_v6 }
  0x41   : > { %291 = vadd.xlane.f32.xlu0 (!%p586_p9), %v290_v4  ;;  %v305_v5 = vsel (!%p586_p9), %vm289_vm0, %v304_v3, 0.0 }
  0x45   : > { %306 = vadd.xlane.f32.xlu0 %v305_v5 }
  0xce   : > { %v292_v7 = vpop.xlane.xlu0 %291 }
  0xcf   : > { %694 = vrsqrt.f32 %v292_v7  ;;  %vm295_vm2 = vcmp.eq.f32.partialorder %v292_v7, inf  ;;  %v298_v11 = vand.u32 2147483648, %v292_v7  ;;  %vm297_vm3 = vcmp.eq.f32.partialorder %v292_v7, 0.0 }
  0xd2   : > { %v307_v8 = vpop.xlane.xlu0 %306 }
  0xd3   : > { %696 = vrsqrt.f32 %v307_v8  ;;  %vm310_vm4 = vcmp.eq.f32.partialorder %v307_v8, inf  ;;  %v313_v17 = vand.u32 2147483648, %v307_v8  ;;  %vm312_vm5 = vcmp.eq.f32.partialorder %v307_v8, 0.0 }
  0xd9   : > { %v695_v9 = vpop.eup %694 }
  0xda   : > { %v294_v10 = vmul.f32 %v695_v9, %v292_v7 }
  0xdc   : > { %v296_v12 = vsel %vm295_vm2, %v292_v7, %v294_v10 }
  0xdd   : > { %v697_v13 = vpop.eup %696  ;;  %v299_v14 = vsel %vm297_vm3, %v298_v11, %v296_v12 }
  0xde   : > { %v300_v15 = vmax.f32 %v299_v14, 1e-12  ;;  %v309_v16 = vmul.f32 %v697_v13, %v307_v8 }
  0xe0   : > { %v311_v18 = vsel %vm310_vm4, %v307_v8, %v309_v16  ;;  %698 = vrcp.f32 %v300_v15 }
  0xe1   : > { %v314_v19 = vsel %vm312_vm5, %v313_v17, %v311_v18 }
  0xe2   : > { %v315_v20 = vmax.f32 %v314_v19, 1e-12 }
  0xe4   : > { %700 = vrcp.f32 %v315_v20 }
  0xea   : > { %v699_v21 = vpop.eup %698 }
  0xeb   : > { %v302_v22 = vmul.f32 %v699_v21, %v287_v0 }
  0xed   : > { %v324_v23 = vmul.f32 5.0, %v302_v22 }
  0xee   : > { %v701_v24 = vpop.eup %700 }
  0xef   : > { %v317_v25 = vmul.f32 %v701_v24, %v303_v1  ;;  %325 = vst.msk [vmem:[#allocation2] sm:$0xff] %vm289_vm0, %v324_v23 }
  0xf1   : > { %v318_v26 = vmul.f32 %v317_v25, %v302_v22 }
  0xf3   : > { %v319_v27 = vsel %vm289_vm0, %v318_v26, 0.0 }
  0xf4   : > { %320 = vadd.xlane.f32.xlu1 %v319_v27 }
 0x181   : > { %v321_v28 = vpop.xlane.xlu1 %320 }
 0x182   : > { %323 = vst.msk [vmem:[%s975_s16] sm:$0xff] %vm322_vm1, %v321_v28 }
 0x183 PF: > { %v327_v29 = vld [vmem:[%s960_s11] sm:$0xff]  ;;  %v328_v30 = vld [vmem:[%s960_s11 + $0x8] sm:$0xff]  ;;  %v329_v31 = vld [vmem:[%s960_s11 + $0x10] sm:$0xff]  ;;  %v812_v32 = vmov 0.0|0.0   ;;  %vm813_vm6 = vmmov 0   ;;  %v814_v39 = vmov 0.0   ;;  %v431_v59 = vlaneseq }
 0x184   : > { %609 = vmatprep.subr.bf16.mxu0 %v812_v32  ;;  %v331_v33 = vmul.f32 %v327_v29, %v327_v29  ;;  %v332_v34 = vmul.f32 %v328_v30, %v328_v30  ;;  %v610_v35 = vpack.c.bf16 %v328_v30, %v327_v29  ;;  %v330_v36 = vld [vmem:[%s960_s11 + $0x18] sm:$0xff]  ;;  %v333_v37 = vmul.f32 %v329_v31, %v329_v31  ;;  %s588_s14 = sshll.u32 %s969_s29, 7  ;;  %p589_p13 = scmp.ge.s32.totalorder %s969_s29, 2 }
 0x185   : > { %v435_v38 = vld [vmem:[%s1035_s0] sm:$0xff]  ;;  %606 = vmatprep.mubr.msk.f32.mxu0 %vm813_vm6, %v814_v39  ;;  %v334_v41 = vmul.f32 %v330_v36, %v330_v36  ;;  %v613_v42 = vpack.c.bf16 %v330_v36, %v329_v31  ;;  %v815_v43 = vmov 0   ;;  %vm355_vm7 = vcmask 261120  }
 0x186   : > { %v335_v40 = vadd.f32 %v332_v34, %v331_v33  ;;  %611 = vmatpush3.bf16.msra.mxu0 %v610_v35  ;;  %702 = vset.pattern.permute.xlu0 %v815_v43  ;;  %v354_v46 = vld [vmem:[#allocation2] sm:$0xff]  ;;  %v432_v60 = vand.u32 127, %v431_v59  ;;  %v433_v61 = vstv %s588_s14  ;;  %vm451_vm11 = vcmask (!%p589_p13), 7168  }
 0x187   : > { %612 = vmatprep.subr.bf16.mxu0 %v812_v32  ;;  %437 = vperm.xlu0 %702, %v435_v38   ;;  %v447_v7 = vld [vmem:[%s980_s10] sm:$0xff] (!%p589_p13) }
 0x188   : > { %v336_v44 = vadd.f32 %v335_v40, %v333_v37  ;;  %v434_v62 = vadd.s32 %v433_v61, %v432_v60 }
 0x18a   : > { %v337_v45 = vadd.f32 %v336_v44, %v334_v41  ;;  %614 = vmatpush3.bf16.msra.mxu0 %v613_v42 }
 0x18c   : > { %v338_v47 = vrot.slane %v337_v45, 4 }
 0x18d   : > { %607 = vmatmul.mubr.msk.f32.vlgmr.msra.gmra.mrb[0].mxu0 %vm355_vm7, %v354_v46 }
 0x18e   : > { %v339_v48 = vadd.f32 %v338_v47, %v337_v45 }
 0x190   : > { %v340_v49 = vrot.slane %v339_v48, 2 }
 0x192   : > { %v341_v50 = vadd.f32 %v340_v49, %v339_v48 }
 0x194   : > { %v342_v51 = vrot.slane %v341_v50, 1 }
 0x196   : > { %v343_v52 = vadd.f32 %v342_v51, %v341_v50 }
 0x198   : > { %703 = vrsqrt.f32 %v343_v52  ;;  %vm346_vm8 = vcmp.eq.f32.partialorder %v343_v52, inf  ;;  %v349_v55 = vand.u32 2147483648, %v343_v52  ;;  %vm348_vm9 = vcmp.eq.f32.partialorder %v343_v52, 0.0 }
 0x1a2   : > { %v704_v53 = vpop.eup %703 }
 0x1a3   : > { %v345_v54 = vmul.f32 %v704_v53, %v343_v52 }
 0x1a5   : > { %v347_v56 = vsel %vm346_vm8, %v343_v52, %v345_v54 }
 0x1a6   : > { %v350_v57 = vsel %vm348_vm9, %v349_v55, %v347_v56 }
 0x1a7   : > { %v351_v58 = vmax.f32 %v350_v57, 1e-12 }
 0x1a9   : > { %705 = vrcp.f32 %v351_v58 }
 0x1b3   : > { %v706_v0 = vpop.eup %705 }
 0x206   : > { %v438_v63 = vpop.permute.xlu0 %437 }
 0x207   : > { %vm439_vm10 = vcmp.eq.s32.totalorder %v434_v62, %v438_v63 }
 0x260   : > { %v425_v1 = vpop.f32.mrb[0].mxu0 }
 0x261   : > { %v429_v2 = vmul.f32 %v706_v0, %v425_v1  ;;  %v608_v3 = vpop.f32.mrb[1].mxu0 }
 0x263   : > { %v440_v4 = vsel %vm439_vm10, 0.0, %v429_v2 }
 0x264   : > { %v441_v5 = vmul.f32 1.442695, %v440_v4 }
 0x266   : > { %707 = vpow2.f32 %v441_v5 }
 0x26a   : > { %446 = sbr.rel (%p589_p13) target bundleno = 770 (0x302), region = 48 }
 0x270   : > { %v708_v6 = vpop.eup %707 }
 0x271   : > { %448 = vadd.xlane.f32.xlu0 %v708_v6 }
 0x2fe   : > { %v449_v8 = vpop.xlane.xlu0 %448 }
 0x2ff   : > { %v450_v9 = vadd.f32 %v449_v8, %v447_v7 }
 0x301   : > { %452 = vst.msk [vmem:[%s980_s10] sm:$0xff] %vm451_vm11, %v450_v9 }
 0x302 PF: > { %p590_p8 = scmp.lt.s32.totalorder %s969_s29, 2 }
 0x303   : > { %vm458_vm12 = vcmp.lt.s32.totalorder (!%p590_p8), %v434_v62, 384  ;;  %vm463_vm13 = vcmask (!%p590_p8), 7168  }
 0x304   : > { %456 = sbr.rel (%p590_p8) target bundleno = 918 (0x396), region = 52  ;;  %v459_v10 = vsel (!%p590_p8), %vm458_vm12, %v708_v6, 0.0 }
 0x305   : > { %460 = vadd.xlane.f32.xlu0 (!%p590_p8), %v459_v10 }
 0x308   : > { %v457_v11 = vld [vmem:[%s980_s10] sm:$0xff] (!%p590_p8) }
 0x392   : > { %v461_v12 = vpop.xlane.xlu0 %460 }
 0x393   : > { %v462_v13 = vadd.f32 %v461_v12, %v457_v11 }
 0x395   : > { %464 = vst.msk [vmem:[%s980_s10] sm:$0xff] %vm463_vm13, %v462_v13 }
 0x396 PF: > { %s19_s25 = sadd.s32 1, %s805_s25   ;;  %s1045_s11 = smov %s917_s18 }
 0x397   : > { %p16_p10 = scmp.ge.s32.totalorder %s19_s25, 6   ;;  %s1046_s18 = smov %s781_s19 }
 0x398   : > { %s1047_s19 = smov %s785_s20  ;;  %s1048_s20 = smov %s1045_s11 }
 0x399   : > { %s1049_s21 = smov %s797_s23  ;;  %s1050_s22 = smov %s801_s24 }
 0x39a   : > { %s1051_s23 = smov %s1054_s27  ;;  %s1052_s24 = smov %s1058_s28 }
 0x39b   :  { %18 = sbr.rel (!%p16_p10) target bundleno = 5 (0x5), region = 100 }
 0x3a2   :  { %498 = vsyncpa [#allocation4], 1 }
 0x3a3   :  { %500 = vsyncpa [#allocation4 + $0x1], 1 }

</bundles_post_ra>
